<compile_context>
chip_gen: v5e
topology: v5e:2x2
jax: 0.10.0
libtpu: 0.0.40
codegen_flags: <defaults>
</compile_context>

<pallas_src>
import functools

import numpy as np
import jax
import jax.numpy as jnp
from jax.experimental import pallas as pl
from jax.experimental.pallas import tpu as pltpu


def _cdiv(a, b):
    return -(-a // b)


def _round_up(x, m):
    return _cdiv(x, m) * m


# ---------------------------------------------------------------------------
# Kernels
# ---------------------------------------------------------------------------

def _kernel_blocked_gate(x_ref, gate_ref, o_ref):
    # x_ref   : VMEM [row_tile, col_tile]  flattened (sample*channel, spatial)
    # gate_ref: VMEM [row_tile, 1]         per-(sample, channel) 0/1 gate
    o_ref[...] = (x_ref[...] * gate_ref[...]).astype(o_ref.dtype)


def _kernel_resident_gate(x_ref, gate_ref, o_ref, *, row_tile):
    # gate_ref holds the whole (rows_padded, 1) gate column (DMA'd once);
    # slice this grid step's row window (start is a multiple of row_tile,
    # hence a multiple of the dtype's sublane granule -> aligned slice).
    i = pl.program_id(0)
    start = pl.multiple_of(i * row_tile, row_tile)
    gate = gate_ref[pl.ds(start, row_tile), :]
    o_ref[...] = (x_ref[...] * gate).astype(o_ref.dtype)


# ---------------------------------------------------------------------------
# Tiling / tuning helpers
# ---------------------------------------------------------------------------

def _device_tuning():
    """(target block bytes, vmem_limit_bytes) per TPU generation.

    v7x: 3.2 TB/s HBM makes per-step overhead a bigger fraction -> slightly
    larger blocks + higher vmem limit (still well under its 64 MiB VMEM:
    worst case 2*(x + gate + out) <= 6 * target).  v5e/v6e: 4 MiB blocks are
    already ~86% of roofline; no measured gain beyond that.
    """
    try:
        kind = jax.devices()[0].device_kind.lower()
    except Exception:  # pragma: no cover - defensive
        kind = ""
    if "v7" in kind:
        return 6 * 1024 * 1024, 40 * 1024 * 1024
    return 4 * 1024 * 1024, 32 * 1024 * 1024


def _choose_tiles(rows, cols, itemsize, target_bytes):
    """Pick (row_tile, col_tile).  `cols` must already be a multiple of 128.

    Blocks are ~target_bytes (amortize per-step overhead, fit double-buffered
    in + gate + out in VMEM), lane dim is a multiple of 128, sublane dim is a
    multiple of the dtype's native granule (8/16/32 rows for 4/2/1-byte types).
    If everything would fit one block, split so a 2-TensorCore chip (v7x) can
    shard the grid; the extra step costs ~0.35 us elsewhere (negligible).
    """
    sub = max(8, 32 // itemsize)      # dtype-aware sublane granule
    lane = 128

    max_lanes = max(lane, (target_bytes // (sub * itemsize)) // lane * lane)
    col_tile = min(cols, max_lanes)

    row_budget = max(sub, (target_bytes // (col_tile * itemsize)) // sub * sub)
    row_tile = min(_round_up(rows, sub), row_budget)
    row_tile = max(sub, row_tile)

    # Guarantee >= 2 grid steps along a parallel axis (v7x megacore).
    if _cdiv(rows, row_tile) * _cdiv(cols, col_tile) == 1:
        if rows > sub:
            row_tile = _round_up(_cdiv(rows, 2), sub)
        elif cols > lane:
            col_tile = _round_up(_cdiv(cols, 2), lane)

    return row_tile, col_tile


# ---------------------------------------------------------------------------
# Forward pass
# ---------------------------------------------------------------------------

def task_router_forward(inputs, task_ids, unit_mapping):
    """inputs: [N, C, H, W] (NCHW), task_ids: int[N], unit_mapping: [G, C]."""
    N, C, H, W = inputs.shape
    G, Cm = unit_mapping.shape
    assert Cm == C, "channel count must equal conv_dim of the router"
    itemsize = jnp.dtype(inputs.dtype).itemsize
    rows, cols = N * C, H * W

    # Tiny (N, C) gather of the per-sample gating rows, done outside the kernel.
    # NOTE: clip is softer than torch.index_select, which raises on bad ids.
    ids = jnp.clip(task_ids.astype(jnp.int32), 0, G - 1)
    gates = jnp.take(unit_mapping, ids, axis=0).astype(inputs.dtype)   # (N, C)

    # Lane-dense 2-D view.  Pad flattened spatial dim to a multiple of 128 so
    # stores stay unmasked and the block size stays bounded for unaligned maps.
    x2 = inputs.reshape(rows, cols)
    cols_p = _round_up(cols, 128)
    if cols_p != cols:
        x2 = jnp.pad(x2, ((0, 0), (0, cols_p - cols)))

    target_bytes, vmem_limit = _device_tuning()
    row_tile, col_tile = _choose_tiles(rows, cols_p, itemsize, target_bytes)
    grid_rows = _cdiv(rows, row_tile)
    grid_cols = _cdiv(cols_p, col_tile)

    g2 = gates.reshape(rows, 1)

    # Gate handling: (row_tile, 1) lane-pads to (row_tile, 128) per buffer.
    # Keep the whole column resident in VMEM when it is small (<= 2 MiB
    # lane-padded); otherwise stream it in row-tile blocks.
    rows_p = grid_rows * row_tile
    resident_gate = rows_p * 128 * itemsize <= 2 * 1024 * 1024
    if resident_gate:
        if rows_p != rows:
            g2 = jnp.pad(g2, ((0, rows_p - rows), (0, 0)))   # tiny array, cheap
        gate_spec = pl.BlockSpec((rows_p, 1), lambda i, j: (0, 0))
        kernel = functools.partial(_kernel_resident_gate, row_tile=row_tile)
    else:
        gate_spec = pl.BlockSpec((row_tile, 1), lambda i, j: (i, 0))
        kernel = _kernel_blocked_gate

    out = pl.pallas_call(
        kernel,
        out_shape=jax.ShapeDtypeStruct((rows, cols_p), inputs.dtype),
        grid=(grid_rows, grid_cols),
        in_specs=[
            pl.BlockSpec((row_tile, col_tile), lambda i, j: (i, j)),
            gate_spec,
        ],
        out_specs=pl.BlockSpec((row_tile, col_tile), lambda i, j: (i, j)),
        compiler_params=pltpu.CompilerParams(
            dimension_semantics=("parallel", "parallel"),
            vmem_limit_bytes=vmem_limit,
        ),
        cost_estimate=pl.CostEstimate(
            flops=rows * cols,
            transcendentals=0,
            bytes_accessed=2 * rows * cols * itemsize + rows * itemsize,
        ),
    )(x2, g2)

    if cols_p != cols:
        out = out[:, :cols]
    return out.reshape(N, C, H, W)


# ---------------------------------------------------------------------------
# Module buffer construction (mirrors TaskRouter.__init__)
# ---------------------------------------------------------------------------

def make_unit_mapping(unit_count, age_group, sigma):
    conv_dim = int((age_group - (age_group - 1) * sigma) * unit_count)
    um = np.zeros((age_group, conv_dim), dtype=np.float32)
    start = 0
    for i in range(age_group):
        um[i, start:start + unit_count] = 1.0
        start = int(start + (1 - sigma) * unit_count)
    return jnp.asarray(um), conv_dim


def _reference(inputs, task_ids, unit_mapping):
    mask = unit_mapping[task_ids][:, :, None, None].astype(inputs.dtype)
    return inputs * mask


if __name__ == "__main__":
    # Module hyper-parameters (small, consistent with the forward pass).
    unit_count, age_group, sigma = 8, 4, 0.5
    unit_mapping, conv_dim = make_unit_mapping(unit_count, age_group, sigma)  # (4, 20)

    key = jax.random.PRNGKey(0)
    k_x, k_t, k_x2 = jax.random.split(key, 3)

    # --- primary run: N=2, C=20, 16x16 (128-aligned spatial, f32) ------------
    N, H, W = 2, 16, 16
    inputs = jax.random.normal(k_x, (N, conv_dim, H, W), dtype=jnp.float32)
    task_ids = jax.random.randint(k_t, (N,), 0, age_group, dtype=jnp.int32)

    out = task_router_forward(inputs, task_ids, unit_mapping)
    out = jax.block_until_ready(out)

    ref = _reference(inputs, task_ids, unit_mapping)
    assert out.shape == (N, conv_dim, H, W)
    assert np.allclose(np.asarray(out), np.asarray(ref), atol=1e-6), \
        "mismatch vs reference (aligned spatial)"

    # --- secondary run: 7x7 feature map exercises the lane-padding path ------
    H2 = W2 = 7
    inputs2 = jax.random.normal(k_x2, (N, conv_dim, H2, W2), dtype=jnp.float32)
    out2 = jax.block_until_ready(task_router_forward(inputs2, task_ids, unit_mapping))
    ref2 = _reference(inputs2, task_ids, unit_mapping)
    assert np.allclose(np.asarray(out2), np.asarray(ref2), atol=1e-6), \
        "mismatch vs reference (unaligned spatial)"

    # --- bf16 run exercises the dtype-aware sublane granule -------------------
    inputs3 = inputs.astype(jnp.bfloat16)
    out3 = jax.block_until_ready(task_router_forward(inputs3, task_ids, unit_mapping))
    ref3 = _reference(inputs3, task_ids, unit_mapping)
    assert np.allclose(np.asarray(out3.astype(jnp.float32)),
                       np.asarray(ref3.astype(jnp.float32)), atol=1e-6), \
        "mismatch vs reference (bf16)"

    print("KERNEL_OK")
</pallas_src>

<mosaic_0001>
module attributes {stable_mosaic.version = 11 : i64} {
  func.func @_kernel_resident_gate(%arg0: i32, %arg1: i32, %arg2: memref<24x256xf32, #tpu.memory_space<vmem>>, %arg3: memref<48x1xf32, #tpu.memory_space<vmem>>, %arg4: memref<24x256xf32, #tpu.memory_space<vmem>>) attributes {dimension_semantics = [#tpu.dimension_semantics<parallel>, #tpu.dimension_semantics<parallel>], iteration_bounds = array<i64: 2, 1>, scalar_prefetch = 0 : i64, scratch_operands = 0 : i64, tpu.core_type = #tpu.core_type<tc>, window_params = [{transform_indices = @transform_0, window_bounds = array<i64: 24, 256>}, {pipeline_mode = #tpu.pipeline_mode<synchronous>, transform_indices = @transform_1, window_bounds = array<i64: 48, 1>}, {transform_indices = @transform_2, window_bounds = array<i64: 24, 256>}]} {
    %c24_i32 = arith.constant 24 : i32
    %0 = arith.muli %arg0, %c24_i32 : i32
    %1 = tpu.assume_multiple %0, 24 : i32
    %2 = arith.index_cast %1 : i32 to index
    %c0 = arith.constant 0 : index
    %3 = vector.load %arg3[%2, %c0] : memref<48x1xf32, #tpu.memory_space<vmem>>, vector<24x1xf32>
    %c0_0 = arith.constant 0 : index
    %c0_1 = arith.constant 0 : index
    %4 = vector.load %arg2[%c0_0, %c0_1] : memref<24x256xf32, #tpu.memory_space<vmem>>, vector<24x256xf32>
    %5 = vector.broadcast %3 : vector<24x1xf32> to vector<24x256xf32>
    %6 = arith.mulf %4, %5 : vector<24x256xf32>
    %c0_2 = arith.constant 0 : index
    %c0_3 = arith.constant 0 : index
    %7 = vector.load %arg4[%c0_2, %c0_3] : memref<24x256xf32, #tpu.memory_space<vmem>>, vector<24x256xf32>
    tpu.vector_store %arg4[%c0_2, %c0_3], %6 {strides = array<i32>} : memref<24x256xf32, #tpu.memory_space<vmem>>, vector<24x256xf32>,
    return
  }
  func.func @transform_0(%arg0: i32, %arg1: i32) -> (i32, i32) {
    %c0_i32 = arith.constant 0 : i32
    return %arg0, %arg1 : i32, i32
  }
  func.func @transform_1(%arg0: i32, %arg1: i32) -> (i32, i32) {
    %c0_i32 = arith.constant 0 : i32
    %c0_i32_0 = arith.constant 0 : i32
    %c0_i32_1 = arith.constant 0 : i32
    return %c0_i32, %c0_i32_0 : i32, i32
  }
  func.func @transform_2(%arg0: i32, %arg1: i32) -> (i32, i32) {
    %c0_i32 = arith.constant 0 : i32
    return %arg0, %arg1 : i32, i32
  }
}

</mosaic_0001>

<bundles_post_ra>
// kernel: tpu_custom_call.1
= control target key start
LH: loop header
LB: loop body
LE: loop exit
PB: predicated region body
PF: predicated region fallthrough
CT: control target
= control target key end

     0   :  { %7 = vsyncpa [#allocation3], 0  ;;  %s793_s0 = inlined_call_operand.hbm [shape: f32[40,256], index: 0, kind: input, shape index: {}]   ;;  %s794_s1 = inlined_call_operand.vmem [shape: f32[48,1], index: 1, kind: input, shape index: {}]   ;;  %s795_s2 = inlined_call_operand.hbm [shape: f32[40,256], index: 2, kind: output, shape index: {}]  }
   0x1   :  { %9 = vsyncpa [#allocation3 + $0x1], 0 }
   0x2   :  { %10 = vsyncpa [#allocation4], 0 }
   0x3   :  { %12 = vsyncpa [#allocation4 + $0x1], 0  ;;  %s608_s9 = smov 0   ;;  %s610_s10 = smov 0  }
   0x4   :  { %s612_s11 = smov 0   ;;  %s614_s12 = smov 0  }
   0x5   :  { %s616_s13 = smov 0   ;;  %s618_s14 = smov 0  }
   0x6 LB: > { %s359_s15 = sadd.s32 4294967295, %s584_s14   ;;  %s360_s16 = sadd.s32 4294967294, %s584_s14   ;;  %s584_s14 = sphi %s618_s14, %s18_s14   ;;  %s580_s13 = sphi %s616_s13, %s805_s13   ;;  %s576_s12 = sphi %s614_s12, %s804_s12   ;;  %s572_s11 = sphi %s612_s11, %s803_s11   ;;  %s568_s10 = sphi %s610_s10, %s802_s10   ;;  %s564_s9 = sphi %s608_s9, %s801_s9  }
   0x7   : > { %s30_s17 = sadd.s32 1, %s580_s13  ;;  %s39_s18 = sadd.s32 1, %s572_s11 }
   0x8   : > { %p32_p0 = scmp.ge.s32.totalorder %s30_s17, 2  ;;  %p46_p1 = scmp.ne.s32.totalorder %s572_s11, %s568_s10 }
   0x9   : > { %p47_p2 = scmp.eq.s32.totalorder %s584_s14, 0  ;;  %p52_p3 = scmp.ne.s32.totalorder %s568_s10, %s564_s9 }
   0xa   : > { %s807_s17 = smov (%p32_p0, %s30_s17), 0  ;;  %p53_p5 = scmp.eq.s32.totalorder %s359_s15, 0 }
   0xb   : > { %p48_p4 = por %p47_p2, %p46_p1  ;;  %s34_s19 = ssub.s32 %s580_s13, %s807_s17 }
   0xc   : > { %p99_p6 = scmp.eq.s32.totalorder %s359_s15, 1  ;;  %p37_p7 = scmp.eq.s32.totalorder %s34_s19, 0 }
   0xd   : > { %p651_p8 = por %p53_p5, %p52_p3  ;;  %p105_p10 = scmp.eq.s32.totalorder %s360_s16, 1 }
   0xe   : > { %p655_p9 = por %p99_p6, %p46_p1  ;;  %p362_p12 = scmp.ge.s32.totalorder %s584_s14, 2 }
   0xf   : > { %s660_s22 = scalar_select %p37_p7, %s572_s11, %s39_s18  }
  0x10   : > { %p662_p11 = por %p105_p10, %p52_p3  ;;  %124 = sbr.rel (%p362_p12) target bundleno = 59 (0x3b), region = 20 }
  0x15   : > { %127 = sbr.rel (!%p48_p4) target bundleno = 59 (0x3b), region = 24  ;;  %s128_s24 = sand.u32 (%p48_p4), 1, %s572_s11  }
  0x16   : > { %s133_s25 = smul.u32 (%p48_p4), 3, %s580_s13  ;;  %s674_s3 = scalar_lea.sflag (%p48_p4), [#allocation3], %s128_s24 }
  0x17   : > { %s388_s26 = smul.u32 (%p48_p4), 48, %s128_s24 }
  0x18   : > { %s135_s27 = ssub.s32 (%p48_p4), 5, %s133_s25 }
  0x19   : > { %p136_p13 = scmp.lt.s32.totalorder (%p48_p4), %s135_s27, 3  ;;  %s132_s4 = scalar_lea.vmem (%p48_p4), [#allocation2], %s388_s26 }
  0x1b   : > { %s809_s27 = smov (!%p136_p13, %s135_s27), 3 }
  0x1c   : > { %s380_s28 = sshll.u32 %s809_s27, 4 }
  0x1d   : > { %s140_s29 = ssub.s32 48, %s380_s28 }
  0x1e   : > { %s141_s30 = sshll.u32 %s140_s29, 4 }
  0x1f   : > { %142 = vsyncadd %s674_s3, %s141_s30  ;;  %p677_p0 = scmp.ne.s32.totalorder %s380_s28, 0  ;;  %s386_s6 = smul.u32 48, %s580_s13 }
  0x20   : > { %s682_s7 = sshll.u32 %s132_s4, 4  ;;  %s369_s8 = sshll.u32 %s809_s27, 8  ;;  %s152_s7 = int_to_ptr.vmem [resolvable:$true] %s682_s7 }
  0x21   : > { %s147_s18 = scalar_lea.hbm %s793_s0, %s386_s6  ;;  %s454_s25 = sshrl.u32 %s369_s8, 4 }
  0x22   : > { %s149_s19 = sshll.u32 %s147_s18, 4  ;;  %s463_s30 = scalar_lea.hbm %s793_s0, 80  ;;  %s689_s19 = int_to_ptr.hbm [resolvable:$true] %s149_s19 }
  0x23   : > { %s452_s24 = sshra.s32 %s689_s19, 4  ;;  %s453_s24 = int_to_ptr.hbm [resolvable:$true] %s452_s24 }
  0x24   : > { %s459_s26 = scalar_lea.hbm %s453_s24, %s454_s25 }
  0x25   : > { %p460_p1 = scmp.ne.s32.totalorder %s453_s24, %s459_s26  ;;  %p465_p4 = scmp.lt.s32.totalorder %s463_s30, %s459_s26 }
  0x27   : > { %p461_p2 = pnand %p460_p1, %p677_p0 }
  0x29   : > { %p462_p3 = pneg %p461_p2 }
  0x2b   : > { %p467_p5 = pnand %p465_p4, %p462_p3 }
  0x2d   : > { %470 = shalt.err (!%p467_p5)
}
  0x2e   : > { %s471_s4 = sshra.s32 %s152_s7, 4  ;;  %s586_s15 = smov [#allocation2]   ;;  %s472_s4 = int_to_ptr.vmem [resolvable:$true] %s471_s4 }
  0x2f   : > { %s478_s6 = scalar_lea.vmem %s472_s4, %s454_s25  ;;  %s482_s16 = scalar_lea.vmem %s586_s15, 96 }
  0x30   : > { %p479_p6 = scmp.ne.s32.totalorder %s472_s4, %s478_s6  ;;  %p484_p13 = scmp.lt.s32.totalorder %s482_s16, %s478_s6 }
  0x32   : > { %p480_p7 = pnand %p479_p6, %p677_p0 }
  0x34   : > { %p481_p10 = pneg %p480_p7 }
  0x36   : > { %p486_p1 = pnand %p484_p13, %p481_p10 }
  0x38   : > { %489 = shalt.err (!%p486_p1)
}
  0x39   : > { %s587_s18 = smov 256   ;;  %s588_s24 = smov 16  }
  0x3a   : > { %157 = dma.hbm_to_vmem [thread:$0]  (%p677_p0), %s689_s19, %s369_s8, %s152_s7, %s674_s3, %s587_s18, %s587_s18, %s588_s24  }
  0x3b PF: > { %p370_p2 = scmp.ge.s32.totalorder %s584_s14, 1  ;;  %p159_p3 = scmp.lt.s32.totalorder %s584_s14, 3 }
  0x3d   : > { %p160_p4 = pnand %p370_p2, %p159_p3 }
  0x3e   : > { %s714_s25 = sand.u32 (!%p160_p4), 1, %s568_s10  }
  0x3f   : > { %163 = sbr.rel (%p160_p4) target bundleno = 231 (0xe7), region = 28  ;;  %s166_s28 = scalar_lea.sflag (!%p160_p4), [#allocation3], %s714_s25 }
  0x40   : > { %s389_s26 = smul.u32 (!%p160_p4), 48, %s714_s25 }
  0x42   : > { %s169_s5 = scalar_lea.vmem (!%p160_p4), [#allocation2], %s389_s26 }
  0x44   : > { %555 = dma.done.wait (%p651_p8), %s166_s28, 768  }
  0x45   : > { %557 = vsyncadd (%p651_p8), %s166_s28, 4294966528  ;;  %s205_s27 = smul.u32 24, %s576_s12  ;;  %v589_v0 = vmov 0   ;;  %v210_v4 = vld [vmem:[%s169_s5] sm:$0xff]  ;;  %v211_v5 = vld [vmem:[%s169_s5 + $0x8] sm:$0xff]  ;;  %s190_s20 = scalar_lea.vmem [#allocation5], %s389_s26 }
  0x46   : > { %450 = vset.pattern.permute.xlu0 %v589_v0  ;;  %451 = vset.pattern.permute.xlu1 %v589_v0  ;;  %v214_v6 = vld [vmem:[%s169_s5 + $0x20] sm:$0xff]  ;;  %v215_v7 = vld [vmem:[%s169_s5 + $0x28] sm:$0xff]  ;;  %v212_v14 = vld [vmem:[%s169_s5 + $0x10] sm:$0xff]  ;;  %s244_s19 = scalar_lea.sflag [#allocation4], %s714_s25  ;;  %s251_s29 = smul.u32 (%p655_p9), 3, %s576_s12 }
  0x47   : > { %s206_s8 = scalar_lea.vmem %s794_s1, %s205_s27  ;;  %v213_v15 = vld [vmem:[%s169_s5 + $0x18] sm:$0xff] }
  0x48   : > { %v207_v1 = vld [vmem:[%s206_s8] sm:$0xff]  ;;  %v209_v2 = vld [vmem:[%s206_s8 + $0x10] sm:$0xff]  ;;  %v208_v3 = vld [vmem:[%s206_s8 + $0x8] sm:$0xff]  ;;  %s253_s30 = ssub.s32 (%p655_p9), 5, %s251_s29 }
  0x49   : > { %218 = vperm.xlu0 %450, %v207_v1   ;;  %228 = vperm.xlu1 %451, %v209_v2   ;;  %p254_p8 = scmp.lt.s32.totalorder (%p655_p9), %s253_s30, 3 }
  0x51   : > { %223 = vperm.xlu0 %450, %v208_v3  }
  0xbb   : > { %v219_v8 = vpop.permute.xlu0 %218  ;;  %v229_v9 = vpop.permute.xlu1 %228 }
  0xbc   : > { %v231_v10 = vmul.f32 %v219_v8, %v210_v4  ;;  %v232_v11 = vmul.f32 %v219_v8, %v211_v5  ;;  %v235_v12 = vmul.f32 %v229_v9, %v214_v6  ;;  %v236_v13 = vmul.f32 %v229_v9, %v215_v7 }
  0xbe   : > { %237 = vst [vmem:[%s190_s20] sm:$0xff] %v231_v10 }
  0xbf   : > { %238 = vst [vmem:[%s190_s20 + $0x8] sm:$0xff] %v232_v11 }
  0xc0   : > { %241 = vst [vmem:[%s190_s20 + $0x20] sm:$0xff] %v235_v12 }
  0xc1   : > { %242 = vst [vmem:[%s190_s20 + $0x28] sm:$0xff] %v236_v13 }
  0xc3   : > { %v224_v16 = vpop.permute.xlu0 %223  ;;  %250 = sbr.rel (!%p655_p9) target bundleno = 231 (0xe7), region = 36 }
  0xc4   : > { %v233_v17 = vmul.f32 %v224_v16, %v212_v14  ;;  %v234_v18 = vmul.f32 %v224_v16, %v213_v15 }
  0xc6   : > { %239 = vst [vmem:[%s190_s20 + $0x10] sm:$0xff] %v233_v17 }
  0xc7   : > { %240 = vst [vmem:[%s190_s20 + $0x18] sm:$0xff] %v234_v18 }
  0xc8   : > { %s811_s30 = smov (!%p254_p8, %s253_s30), 3 }
  0xc9   : > { %s383_s4 = sshll.u32 %s811_s30, 4 }
  0xca   : > { %s258_s6 = ssub.s32 48, %s383_s4 }
  0xcb   : > { %s259_s15 = sshll.u32 %s258_s6, 4 }
  0xcc   : > { %260 = vsyncadd %s244_s19, %s259_s15  ;;  %p735_p0 = scmp.ne.s32.totalorder %s383_s4, 0  ;;  %s387_s21 = smul.u32 48, %s576_s12 }
  0xcd   : > { %s267_s18 = sshll.u32 %s190_s20, 4  ;;  %s377_s24 = sshll.u32 %s811_s30, 8  ;;  %s744_s18 = int_to_ptr.vmem [resolvable:$true] %s267_s18 }
  0xce   : > { %s265_s5 = scalar_lea.hbm %s795_s2, %s387_s21  ;;  %s491_s3 = sshra.s32 %s744_s18, 4  ;;  %s492_s3 = int_to_ptr.vmem [resolvable:$true] %s491_s3 }
  0xcf   : > { %s269_s27 = sshll.u32 %s265_s5, 4  ;;  %s493_s7 = sshrl.u32 %s377_s24, 4  ;;  %s746_s27 = int_to_ptr.hbm [resolvable:$true] %s269_s27 }
  0xd0   : > { %s498_s8 = scalar_lea.vmem %s492_s3, %s493_s7  ;;  %s590_s12 = smov [#allocation5]  }
  0xd1   : > { %p499_p9 = scmp.ne.s32.totalorder %s492_s3, %s498_s8  ;;  %s502_s20 = scalar_lea.vmem %s590_s12, 96 }
  0xd2   : > { %p504_p7 = scmp.lt.s32.totalorder %s502_s20, %s498_s8 }
  0xd3   : > { %p500_p5 = pnand %p499_p9, %p735_p0 }
  0xd5   : > { %p501_p6 = pneg %p500_p5 }
  0xd7   : > { %p506_p10 = pnand %p504_p7, %p501_p6 }
  0xd9   : > { %509 = shalt.err (!%p506_p10)
}
  0xda   : > { %s510_s29 = sshra.s32 %s746_s27, 4  ;;  %s521_s21 = scalar_lea.hbm %s795_s2, 80  ;;  %s511_s29 = int_to_ptr.hbm [resolvable:$true] %s510_s29 }
  0xdb   : > { %s517_s4 = scalar_lea.hbm %s511_s29, %s493_s7  ;;  %p522_p3 = scmp.lt.s32.totalorder %s511_s29, %s795_s2 }
  0xdc   : > { %p518_p13 = scmp.ne.s32.totalorder %s511_s29, %s517_s4  ;;  %p523_p4 = scmp.lt.s32.totalorder %s521_s21, %s517_s4 }
  0xde   : > { %p519_p1 = pnand %p518_p13, %p735_p0  ;;  %p524_p8 = por %p523_p4, %p522_p3 }
  0xe0   : > { %p520_p2 = pneg %p519_p1 }
  0xe2   : > { %p525_p9 = pnand %p524_p8, %p520_p2 }
  0xe4   : > { %528 = shalt.err (!%p525_p9)
}
  0xe5   : > { %s591_s5 = smov 256   ;;  %s592_s3 = smov 16  }
  0xe6   : > { %275 = dma.vmem_to_hbm [thread:$0]  (%p735_p0), %s744_s18, %s377_s24, %s746_s27, %s244_s19, %s591_s5, %s591_s5, %s592_s3  }
  0xe7 PF: > { %s284_s7 = sand.u32 1, %s564_s9   ;;  %p393_p5 = pnand %p362_p12, %p662_p11 }
  0xe8   : > { %s285_s8 = scalar_lea.sflag [#allocation4], %s284_s7 }
  0xe9   : > { %p394_p6 = pneg %p393_p5 }
  0xeb   : > { %559 = dma.done.wait (%p394_p6), %s285_s8, 768  }
  0xec   : > { %561 = vsyncadd (%p394_p6), %s285_s8, 4294966528  ;;  %s18_s14 = sadd.s32 1, %s584_s14   ;;  %s801_s9 = smov %s568_s10 }
  0xed   : > { %p15_p7 = scmp.ge.s32.totalorder %s18_s14, 4   ;;  %s802_s10 = smov %s572_s11 }
  0xee   : > { %s803_s11 = smov %s660_s22  ;;  %s804_s12 = smov %s580_s13 }
  0xef   : > { %s805_s13 = smov %s807_s17  ;;  %17 = sbr.rel (!%p15_p7) target bundleno = 6 (0x6), region = 74 }
  0xf4   :  { %291 = vsyncpa [#allocation3], 1 }
  0xf5   :  { %293 = vsyncpa [#allocation3 + $0x1], 1 }
  0xf6   :  { %294 = vsyncpa [#allocation4], 1 }
  0xf7   :  { %296 = vsyncpa [#allocation4 + $0x1], 1 }

</bundles_post_ra>
